<compile_context>
chip_gen: v7x
topology: tpu7x:2x2x1
jax: 0.10.0
libtpu: 0.0.40
codegen_flags: <defaults>
</compile_context>

<pallas_src>
import functools

import jax
import jax.numpy as jnp
from jax.experimental import pallas as pl
from jax.experimental.pallas import tpu as pltpu


def _round_up(x, m):
    return (x + m - 1) // m * m


def _patch_embed_kernel(x_ref, w_ref, b_ref, o_ref):
    # x_ref: (TM, K_pad) bf16 patch tile, w_ref: (K_pad, N_pad) bf16 (resident),
    # b_ref: (1, N_pad) f32 (resident).  f32 accumulate + bias, cast on store.
    acc = jnp.dot(x_ref[...], w_ref[...], preferred_element_type=jnp.float32)
    o_ref[...] = (acc + b_ref[...]).astype(o_ref.dtype)


def prepare_patch_embed_params(weight, bias):
    """Pad + cast the projection parameters ONCE per model (not per forward).

    weight (embed_dim, C, P, P) -> (K_pad, N_pad) bf16 with K, N zero-padded to
    multiples of 128 so every MXU issue / vector load-store is full-width.
    bias (embed_dim,) -> (1, N_pad) f32.
    """
    embed_dim, C, P, _ = weight.shape
    K = C * P * P
    K_pad = _round_up(K, 128)
    N_pad = _round_up(embed_dim, 128)
    w_mat = weight.reshape(embed_dim, K).T.astype(jnp.bfloat16)
    w_p = jnp.zeros((K_pad, N_pad), jnp.bfloat16).at[:K, :embed_dim].set(w_mat)
    b_p = jnp.zeros((1, N_pad), jnp.float32).at[:, :embed_dim].set(
        bias.astype(jnp.float32).reshape(1, embed_dim))
    return w_p, b_p


def patch_embed_apply(x, w_p, b_p, embed_dim, patch_size, *, tile_m=1024,
                      out_dtype=None):
    """x: (B, C, H, W); w_p/b_p from prepare_patch_embed_params.

    out_dtype defaults to x.dtype (matches the PyTorch module); pass bf16 for a
    memory-bound win when the downstream consumer accepts bf16 activations.
    """
    B, C, H, W = x.shape
    P = patch_size
    assert H % P == 0 and W % P == 0
    gh, gw = H // P, W // P
    num_patches = gh * gw
    K = C * P * P
    K_pad, N_pad = w_p.shape
    N = embed_dim
    out_dtype = x.dtype if out_dtype is None else jnp.dtype(out_dtype)
    M = B * num_patches

    # im2col view of the non-overlapping PxP patches + bf16 cast (+ K pad when
    # K % 128 != 0).  With allow_input_fusion on operand 0 XLA fuses this chain
    # into the Pallas input DMA -> no materialized (M, K) copy in HBM.
    patches = x.reshape(B, C, gh, P, gw, P).transpose(0, 2, 4, 1, 3, 5)
    patches = patches.reshape(M, K).astype(jnp.bfloat16)
    if K_pad != K:
        patches = jnp.pad(patches, ((0, 0), (0, K_pad - K)))

    # M tiling: large blocks amortize the ~0.35us/step pipeline overhead; a
    # cdiv grid with a masked partial last block replaces the old zeros+set
    # M-padding copy.  v7x: keep tile_m <= 1024 so the footprint stays within
    # 64 MiB VMEM and the "parallel" M axis still splits across both TCs;
    # v5e/v6e: tile_m up to 2048 is fine (vmem_limit is raised automatically).
    TM = min(tile_m, _round_up(M, 8))
    grid_m = pl.cdiv(M, TM)

    out_itemsize = jnp.dtype(out_dtype).itemsize
    # Per-step VMEM: double-buffered LHS + output tiles, resident weight/bias.
    # TODO(synk): single-buffer the resident weight/bias (pl.Buffered(1)) to
    # shave ~K_pad*N_pad*2B of VMEM on v7x once that path is load-bearing.
    footprint = (2 * TM * K_pad * 2 + 2 * K_pad * N_pad * 2 + 2 * N_pad * 4
                 + 2 * TM * N_pad * out_itemsize)
    vmem_limit = min(max(32 << 20, footprint * 3 // 2 + (2 << 20)), 64 << 20)

    cost = pl.CostEstimate(
        flops=2 * M * K * N,
        transcendentals=0,
        bytes_accessed=int(x.size * x.dtype.itemsize + w_p.size * 2
                           + b_p.size * 4 + M * N * out_itemsize),
    )

    out = pl.pallas_call(
        _patch_embed_kernel,
        out_shape=jax.ShapeDtypeStruct((M, N_pad), out_dtype),
        grid_spec=pltpu.PrefetchScalarGridSpec(
            num_scalar_prefetch=0,
            grid=(grid_m,),
            in_specs=[
                pl.BlockSpec((TM, K_pad), lambda i: (i, 0)),     # patch tile
                pl.BlockSpec((K_pad, N_pad), lambda i: (0, 0)),  # proj (resident)
                pl.BlockSpec((1, N_pad), lambda i: (0, 0)),      # bias (resident)
            ],
            out_specs=pl.BlockSpec((TM, N_pad), lambda i: (i, 0)),
        ),
        compiler_params=pltpu.CompilerParams(
            dimension_semantics=("parallel",),        # independent M tiles -> megacore
            allow_input_fusion=[True, False, False],  # fuse im2col into LHS DMA
            vmem_limit_bytes=int(vmem_limit),
        ),
        cost_estimate=cost,
    )(patches, w_p, b_p)

    # Strip N padding (no-op when embed_dim % 128 == 0) and reshape to
    # (B, num_patches, embed_dim).  Output was sized (M, N_pad): no M slice.
    if N_pad != N:
        out = out[:, :N]
    return out.reshape(B, num_patches, N)


def patch_embed_forward(x, weight, bias, patch_size, *, tile_m=1024,
                        out_dtype=None):
    """Convenience wrapper: PatchEmbed.forward from raw Conv2d params."""
    w_p, b_p = prepare_patch_embed_params(weight, bias)
    return patch_embed_apply(x, w_p, b_p, weight.shape[0], patch_size,
                             tile_m=tile_m, out_dtype=out_dtype)


if __name__ == "__main__":
    # Small shapes consistent with the module: img=16, patch=8, C=4, embed=32
    B, C, H, W = 2, 4, 16, 16
    P = 8
    embed_dim = 32

    key = jax.random.PRNGKey(0)
    kx, kw, kb = jax.random.split(key, 3)
    x = jax.random.normal(kx, (B, C, H, W), dtype=jnp.float32)
    # nn.Conv2d params: weight (out, in, kh, kw), bias (out,)
    weight = jax.random.normal(kw, (embed_dim, C, P, P), dtype=jnp.float32) * 0.02
    bias = jax.random.normal(kb, (embed_dim,), dtype=jnp.float32) * 0.02

    # Params are padded/cast once (per-model), activations go straight through.
    w_p, b_p = prepare_patch_embed_params(weight, bias)
    fwd = jax.jit(functools.partial(patch_embed_apply, embed_dim=embed_dim,
                                    patch_size=P))
    out = fwd(x, w_p, b_p)
    out = jax.block_until_ready(out)

    # reference: lax conv with f32 math (kernel uses bf16 MXU inputs, so the
    # tolerance is relaxed to the bf16 input-rounding level).
    ref = jax.lax.conv_general_dilated(
        x, weight, window_strides=(P, P), padding="VALID",
        dimension_numbers=("NCHW", "OIHW", "NCHW"))
    ref = ref + bias.reshape(1, embed_dim, 1, 1)
    ref = ref.reshape(B, embed_dim, -1).transpose(0, 2, 1)

    assert out.shape == (B, (H // P) * (W // P), embed_dim)
    assert out.dtype == x.dtype
    assert jnp.allclose(out, ref, atol=2e-2, rtol=2e-2)

    print("KERNEL_OK")
</pallas_src>

<mosaic_0001>
module attributes {stable_mosaic.version = 11 : i64} {
  func.func @_patch_embed_kernel(%arg0: i32, %arg1: memref<8x256xbf16, #tpu.memory_space<vmem>>, %arg2: memref<256x128xbf16, #tpu.memory_space<vmem>>, %arg3: memref<1x128xf32, #tpu.memory_space<vmem>>, %arg4: memref<8x128xf32, #tpu.memory_space<vmem>>) attributes {dimension_semantics = [#tpu.dimension_semantics<parallel>], iteration_bounds = array<i64: 1>, scalar_prefetch = 0 : i64, scratch_operands = 0 : i64, tpu.core_type = #tpu.core_type<tc>, window_params = [{transform_indices = @transform_0, window_bounds = array<i64: 8, 256>}, {pipeline_mode = #tpu.pipeline_mode<synchronous>, transform_indices = @transform_1, window_bounds = array<i64: 256, 128>}, {pipeline_mode = #tpu.pipeline_mode<synchronous>, transform_indices = @transform_2, window_bounds = array<i64: 1, 128>}, {transform_indices = @transform_3, window_bounds = array<i64: 8, 128>}]} {
    %c0 = arith.constant 0 : index
    %c0_0 = arith.constant 0 : index
    %0 = vector.load %arg1[%c0, %c0_0] : memref<8x256xbf16, #tpu.memory_space<vmem>>, vector<8x256xbf16>
    %c0_1 = arith.constant 0 : index
    %c0_2 = arith.constant 0 : index
    %1 = vector.load %arg2[%c0_1, %c0_2] : memref<256x128xbf16, #tpu.memory_space<vmem>>, vector<256x128xbf16>
    %cst = arith.constant dense<0.000000e+00> : vector<8x128xf32>
    %2 = tpu.matmul %0, %1, %cst {dimension_numbers = #tpu.dot_dimension_numbers<[1], [0], [0], [1], [0, 0, 1, 1], [], []>} : vector<8x256xbf16>, vector<256x128xbf16>, vector<8x128xf32> -> vector<8x128xf32>
    %c0_3 = arith.constant 0 : index
    %c0_4 = arith.constant 0 : index
    %3 = vector.load %arg3[%c0_3, %c0_4] : memref<1x128xf32, #tpu.memory_space<vmem>>, vector<1x128xf32>
    %4 = vector.broadcast %3 : vector<1x128xf32> to vector<8x128xf32>
    %5 = arith.addf %2, %4 : vector<8x128xf32>
    %c0_5 = arith.constant 0 : index
    %c0_6 = arith.constant 0 : index
    %6 = vector.load %arg4[%c0_5, %c0_6] : memref<8x128xf32, #tpu.memory_space<vmem>>, vector<8x128xf32>
    tpu.vector_store %arg4[%c0_5, %c0_6], %5 {strides = array<i32>} : memref<8x128xf32, #tpu.memory_space<vmem>>, vector<8x128xf32>,
    return
  }
  func.func @transform_0(%arg0: i32) -> (i32, i32) {
    %c0_i32 = arith.constant 0 : i32
    %c0_i32_0 = arith.constant 0 : i32
    return %arg0, %c0_i32 : i32, i32
  }
  func.func @transform_1(%arg0: i32) -> (i32, i32) {
    %c0_i32 = arith.constant 0 : i32
    %c0_i32_0 = arith.constant 0 : i32
    %c0_i32_1 = arith.constant 0 : i32
    return %c0_i32, %c0_i32_0 : i32, i32
  }
  func.func @transform_2(%arg0: i32) -> (i32, i32) {
    %c0_i32 = arith.constant 0 : i32
    %c0_i32_0 = arith.constant 0 : i32
    %c0_i32_1 = arith.constant 0 : i32
    return %c0_i32, %c0_i32_0 : i32, i32
  }
  func.func @transform_3(%arg0: i32) -> (i32, i32) {
    %c0_i32 = arith.constant 0 : i32
    %c0_i32_0 = arith.constant 0 : i32
    return %arg0, %c0_i32 : i32, i32
  }
}

</mosaic_0001>

<bundles_post_ra>
// kernel: patch_embed_apply.1
= control target key start
LH: loop header
LB: loop body
LE: loop exit
PB: predicated region body
PF: predicated region fallthrough
CT: control target
= control target key end

     0   :  { %s385_s0 = inlined_call_operand.vmem [shape: bf16[8,256], index: 0, kind: input, shape index: {}]   ;;  %s386_s1 = inlined_call_operand.vmem [shape: bf16[256,128], index: 1, kind: input, shape index: {}]   ;;  %s387_s2 = inlined_call_operand.vmem [shape: f32[1,128], index: 2, kind: input, shape index: {}]   ;;  %s388_s3 = inlined_call_operand.hbm [shape: f32[8,128], index: 3, kind: output, shape index: {}]  }
   0x1   :  { %v256_v0 = vld [vmem:[%s386_s1 + $0x40] sm:$0xff]   ;;  %v258_v2 = vld [vmem:[%s386_s1 + $0x48] sm:$0xff]   ;;  %v260_v4 = vld [vmem:[%s386_s1 + $0x50] sm:$0xff]  }
   0x2   :  { %v257_v1 = vld [vmem:[%s386_s1] sm:$0xff]   ;;  %233 = vmatprep.subr.bf16.mxu0 %v256_v0  ;;  %v259_v3 = vld [vmem:[%s386_s1 + $0x8] sm:$0xff]   ;;  %v261_v5 = vld [vmem:[%s386_s1 + $0x10] sm:$0xff]  }
   0x3   :  { %234 = vmatpush3.bf16.msra.mxu0 %v257_v1  ;;  %v262_v6 = vld [vmem:[%s386_s1 + $0x58] sm:$0xff]   ;;  %v264_v8 = vld [vmem:[%s386_s1 + $0x60] sm:$0xff]   ;;  %v266_v10 = vld [vmem:[%s386_s1 + $0x68] sm:$0xff]  }
   0x4   :  { %235 = vmatprep.subr.bf16.mxu0 %v258_v2  ;;  %v263_v7 = vld [vmem:[%s386_s1 + $0x18] sm:$0xff]   ;;  %v265_v9 = vld [vmem:[%s386_s1 + $0x20] sm:$0xff]  }
   0x5   :  { %v16_v11 = vld [vmem:[%s385_s0] sm:$0xff] }
   0x7   :  { %236 = vmatpush3.bf16.msra.mxu0 %v259_v3 }
   0x8   :  { %237 = vmatprep.subr.bf16.mxu0 %v260_v4 }
   0xb   :  { %238 = vmatpush3.bf16.msra.mxu0 %v261_v5 }
   0xc   :  { %239 = vmatprep.subr.bf16.mxu0 %v262_v6 }
   0xf   :  { %240 = vmatpush3.bf16.msra.mxu0 %v263_v7 }
  0x10   :  { %241 = vmatprep.subr.bf16.mxu0 %v264_v8 }
  0x11   :  { %8 = vsyncpa [#allocation3], 0  ;;  %v216_v12 = vcombine.high %v16_v11, %v16_v11  ;;  %v267_v13 = vld [vmem:[%s386_s1 + $0x28] sm:$0xff]   ;;  %v268_v14 = vld [vmem:[%s386_s1 + $0x70] sm:$0xff]   ;;  %v215_v18 = vcombine.low %v16_v11, %v16_v11  ;;  %s298_s20 = smov [#allocation2]  }
  0x12   :  { %v269_v15 = vld [vmem:[%s386_s1 + $0x30] sm:$0xff]   ;;  %v270_v16 = vld [vmem:[%s386_s1 + $0x78] sm:$0xff]   ;;  %v214_v21 = vld [vmem:[%s387_s2] ss:$0 sm:$0xff]  ;;  %s206_s21 = sshll.u32 %s298_s20, 4  ;;  %s207_s21 = int_to_ptr.vmem [resolvable:$true] %s206_s21 }
  0x13   :  { %242 = vmatpush3.bf16.msra.mxu0 %v265_v9  ;;  %191 = vmatprep.mubr.bf16.mxu0 %v216_v12  ;;  %v271_v17 = vld [vmem:[%s386_s1 + $0x38] sm:$0xff]   ;;  %s274_s22 = scalar_lea.vmem %s207_s21, 128  ;;  %p279_p1 = scmp.lt.s32.totalorder %s207_s21, %s207_s21 }
  0x14   :  { %243 = vmatprep.subr.bf16.mxu0 %v266_v10  ;;  %p275_p0 = scmp.ne.s32.totalorder %s207_s21, %s274_s22  ;;  %p280_p2 = scmp.lt.s32.totalorder %s274_s22, %s274_s22 }
  0x16   :  { %p281_p3 = por %p280_p2, %p279_p1 }
  0x17   :  { %244 = vmatpush3.bf16.msra.mxu0 %v267_v13 }
  0x18   :  { %245 = vmatprep.subr.bf16.mxu0 %v268_v14  ;;  %p282_p4 = pnand %p281_p3, %p275_p0 }
  0x1b   :  { %246 = vmatpush3.bf16.msra.mxu0 %v269_v15 }
  0x1c   :  { %247 = vmatprep.subr.bf16.mxu0 %v270_v16 }
  0x1f   :  { %248 = vmatpush3.bf16.msra.mxu0 %v271_v17 }
  0x22   :  { %192 = vmatmul.mubr.bf16.vlgmr.msra.gmra.mrb[0].mxu0 %v215_v18 }
  0xf5   :  { %v249_v19 = vpop.f32.mrb[0].mxu0 }
  0xf6   :  { %v250_v20 = vpop.f32.mrb[1].mxu0 }
  0xf7   :  { %v251_v22 = vadd.f32 %v250_v20, %v249_v19  ;;  %v252_v23 = vpop.f32.mrb[2].mxu0 }
  0xf8   :  { %v253_v24 = vpop.f32.mrb[3].mxu0 }
  0xf9   :  { %v194_v25 = vadd.f32 %v251_v22, %v214_v21 }
  0xfb   :  { %199 = vst [vmem:[#allocation2] sm:$0xff] %v194_v25 }
  0xfc   :  { %285 = shalt.err (!%p282_p4)
}
  0xfd   :  { %s286_s24 = scalar_lea.hbm %s388_s3, 128 }
  0xfe   :  { %p287_p5 = scmp.ne.s32.totalorder %s388_s3, %s286_s24  ;;  %p290_p6 = scmp.lt.u32.totalorder %s286_s24, %s388_s3 }
 0x100   :  { %p292_p7 = pnand %p290_p6, %p287_p5 }
 0x102   :  { %295 = shalt.err (!%p292_p7)
}
 0x103   :  { %209 = dma.vmem_to_hbm [thread:$0]  %s207_s21, 128, %s388_s3, [#allocation3]  }
 0x104   :  { %296 = dma.done.wait [#allocation3], 128  }
 0x105   :  { %297 = vsyncadd [#allocation3], 4294967168 }
 0x106   :  { %213 = vsyncpa [#allocation3], 1 }

</bundles_post_ra>
